<compile_context>
chip_gen: v5e
topology: v5e:2x2
jax: 0.10.0
libtpu: 0.0.40
codegen_flags: <defaults>
</compile_context>

<pallas_src>
import jax
import jax.numpy as jnp
from jax.experimental import pallas as pl
from jax.experimental.pallas import tpu as pltpu


# TODO(synk): the torch module is generic over arbitrary sub-models; here the
# members are instantiated as linear models (the only form one generic fused
# kernel can express).  Other sub-model architectures would need their own
# kernels feeding the same concatenated-column output layout.


def _ensemble_kernel(x_ref, w_ref, b_ref, o_ref, acc_ref):
    """One (bt x tn) output block, reduced over the K (hidden) grid axis.

    x_ref: (bt, kt)  w_ref: (kt, tn)  b_ref: (1, tn)  o_ref: (bt, tn)
    acc_ref: (bt, tn) f32 scratch, persistent across the K axis.
    """
    @pl.when(pl.program_id(2) == 0)
    def _init():
        acc_ref[...] = jnp.zeros_like(acc_ref)

    acc_ref[...] += jnp.dot(
        x_ref[...], w_ref[...], preferred_element_type=jnp.float32
    )

    @pl.when(pl.program_id(2) == pl.num_programs(2) - 1)
    def _finalize():
        # f32 bias add + cast stay inside the kernel (VPU, hidden under the
        # matmul epilogue) rather than as a separate wrapper-side XLA op.
        o_ref[...] = (acc_ref[...] + b_ref[...].astype(jnp.float32)).astype(
            o_ref.dtype
        )


def _pick_tile(dim, target, align):
    """Largest tile <= target that divides `dim` and is a multiple of `align`.

    Falls back to the full dimension (always a legal block extent) when no
    aligned divisor exists — never silently changes semantics.
    """
    if dim <= target:
        return dim
    t = (target // align) * align
    while t >= align:
        if dim % t == 0:
            return t
        t -= align
    return dim


def pack_ensemble_params(weights, biases):
    """One-time (init-time) repack.

    (M, H, O) -> w_cat (H, M*O_pad);  (M, 1, O) -> b_cat (1, M*O_pad).
    Model i's output occupies columns [i*O_pad, i*O_pad + O); O is padded to a
    multiple of 128 so the kernel's output stores stay lane-dense for any O.
    Do this ONCE at init — it is a full HBM round trip of the weights.
    """
    M, H, O = weights.shape
    assert biases.shape == (M, 1, O)
    O_pad = ((O + 127) // 128) * 128
    if O_pad != O:
        weights = jnp.pad(weights, ((0, 0), (0, 0), (0, O_pad - O)))
        biases = jnp.pad(biases, ((0, 0), (0, 0), (0, O_pad - O)))
    w_cat = jnp.transpose(weights, (1, 0, 2)).reshape(H, M * O_pad)
    b_cat = biases.reshape(1, M * O_pad)
    return w_cat, b_cat, (M, O, O_pad)


def model_ensemble_forward(x, w_cat, b_cat, meta, *,
                           batch_tile_target=256,   # 128 is better on v5e
                           col_tile_target=512,
                           k_tile_target=512):
    """x: (B, H); pre-packed w_cat: (H, M*O_pad), b_cat: (1, M*O_pad) -> (B, M*O).

    Equivalent to torch.cat([x @ W_i + b_i for i in range(M)], dim=1).
    """
    M, O, O_pad = meta
    B, H = x.shape
    N_pad = M * O_pad
    assert w_cat.shape == (H, N_pad) and b_cat.shape == (1, N_pad)

    # ---- tile selection -----------------------------------------------------
    # Batch rows: multiples of 8 (sublane), target 256 to keep the MXU rows
    # occupied when B is large; full-B fallback keeps non-divisible B legal.
    bt = _pick_tile(B, batch_tile_target, 8)
    # Reduction (K = H): only tiled for large H; small H is a single block.
    kt = _pick_tile(H, k_tile_target, 128)
    # Output columns (N = M*O_pad): always a multiple of 128.  If the batch
    # grid axis collapses (small B), force >= 2 column tiles so there is a
    # non-trivial "parallel" axis for v7x's two TensorCores to split, and so
    # the weights stream in column tiles instead of one monolithic VMEM slab.
    n_target = col_tile_target
    if B // bt == 1 and N_pad >= 2 * 128:
        n_target = min(n_target, max(128, (N_pad // 2) // 128 * 128))
    tn = _pick_tile(N_pad, n_target, 128)

    grid = (N_pad // tn, B // bt, H // kt)

    # Rough per-step VMEM footprint (double-buffered inputs/outputs + f32 acc)
    # with 2x headroom; explicit limit matters most on v5e's 16 MiB scoped
    # default and under v7x's 64 MiB physical VMEM.
    itm = x.dtype.itemsize
    est = (2 * bt * kt * itm
           + 2 * kt * tn * w_cat.dtype.itemsize
           + 2 * tn * b_cat.dtype.itemsize
           + 2 * bt * tn * itm
           + bt * tn * 4)
    vmem_limit = int(min(max(2 * est, 8 << 20), 40 << 20))

    out_padded = pl.pallas_call(
        _ensemble_kernel,
        out_shape=jax.ShapeDtypeStruct((B, N_pad), x.dtype),
        # Grid order: column tiles (outer, parallel) -> batch tiles (parallel)
        # -> K reduction (innermost, arbitrary).  With a single K step the
        # weight block index is constant across all batch steps of a column
        # tile (weight-stationary: no weight re-DMA while x/out stream).
        grid=grid,
        in_specs=[
            pl.BlockSpec((bt, kt), lambda j, i, k: (i, k)),   # x row slab
            pl.BlockSpec((kt, tn), lambda j, i, k: (k, j)),   # packed weights
            pl.BlockSpec((1, tn), lambda j, i, k: (0, j)),    # packed biases
        ],
        # Lane-dense (bt, tn) output slab (tn multiple of 128) == cat(dim=1).
        out_specs=pl.BlockSpec((bt, tn), lambda j, i, k: (i, j)),
        scratch_shapes=[pltpu.VMEM((bt, tn), jnp.float32)],
        compiler_params=pltpu.CompilerParams(
            # Column and batch blocks are disjoint (no accumulation across
            # them) -> parallel; K carries the accumulator -> arbitrary.
            dimension_semantics=("parallel", "parallel", "arbitrary"),
            vmem_limit_bytes=vmem_limit,
        ),
    )(x, w_cat, b_cat)

    if O_pad == O:
        return out_padded
    # Drop per-model lane padding (cheap slice; skipped when O % 128 == 0).
    return out_padded.reshape(B, M, O_pad)[:, :, :O].reshape(B, M * O)


if __name__ == "__main__":
    # Small, hardware-friendly shapes: batch=8, hidden=32, per-model out=128, 3 models.
    B, H, O, M = 8, 32, 128, 3

    key = jax.random.PRNGKey(0)
    kx, kw, kb = jax.random.split(key, 3)

    x = jax.random.normal(kx, (B, H), dtype=jnp.float32)
    weights = jax.random.normal(kw, (M, H, O), dtype=jnp.float32) * 0.05
    biases = jax.random.normal(kb, (M, 1, O), dtype=jnp.float32) * 0.01

    # Pack once at init time; every forward call reuses the packed params.
    w_cat, b_cat, meta = pack_ensemble_params(weights, biases)
    w_cat, b_cat = jax.block_until_ready((w_cat, b_cat))

    fwd = jax.jit(lambda xx, wc, bc: model_ensemble_forward(xx, wc, bc, meta))
    out = jax.block_until_ready(fwd(x, w_cat, b_cat))

    # Reference check in plain JAX (same semantics as the torch module).
    ref = jnp.concatenate(
        [x @ weights[i] + biases[i] for i in range(M)], axis=1
    )
    assert out.shape == (B, M * O)
    assert jnp.allclose(out, ref, atol=1e-4, rtol=1e-4)

    print("KERNEL_OK")
</pallas_src>

<mosaic_0001>
module attributes {stable_mosaic.version = 11 : i64} {
  func.func @_ensemble_kernel(%arg0: i32, %arg1: i32, %arg2: i32, %arg3: memref<8x32xf32, #tpu.memory_space<vmem>>, %arg4: memref<32x128xf32, #tpu.memory_space<vmem>>, %arg5: memref<1x128xf32, #tpu.memory_space<vmem>>, %arg6: memref<8x128xf32, #tpu.memory_space<vmem>>, %arg7: memref<8x128xf32, #tpu.memory_space<vmem>>) attributes {dimension_semantics = [#tpu.dimension_semantics<parallel>, #tpu.dimension_semantics<parallel>, #tpu.dimension_semantics<arbitrary>], iteration_bounds = array<i64: 3, 1, 1>, scalar_prefetch = 0 : i64, scratch_operands = 1 : i64, tpu.core_type = #tpu.core_type<tc>, window_params = [{transform_indices = @transform_0, window_bounds = array<i64: 8, 32>}, {transform_indices = @transform_1, window_bounds = array<i64: 32, 128>}, {transform_indices = @transform_2, window_bounds = array<i64: 1, 128>}, {transform_indices = @transform_3, window_bounds = array<i64: 8, 128>}]} {
    %c0_i32 = arith.constant 0 : i32
    %0 = arith.cmpi eq, %arg2, %c0_i32 : i32
    %1 = arith.extui %0 : i1 to i32
    %c0_i32_0 = arith.constant 0 : i32
    %2 = arith.cmpi ne, %1, %c0_i32_0 : i32
    scf.if %2 {
      %cst_10 = arith.constant 0.000000e+00 : f32
      %12 = vector.broadcast %cst_10 : f32 to vector<8x128xf32>
      %c0_11 = arith.constant 0 : index
      %c0_12 = arith.constant 0 : index
      %13 = vector.load %arg7[%c0_11, %c0_12] : memref<8x128xf32, #tpu.memory_space<vmem>>, vector<8x128xf32>
      tpu.vector_store %arg7[%c0_11, %c0_12], %12 {strides = array<i32>} : memref<8x128xf32, #tpu.memory_space<vmem>>, vector<8x128xf32>,
    } else {
    }
    %c0 = arith.constant 0 : index
    %c0_1 = arith.constant 0 : index
    %3 = vector.load %arg7[%c0, %c0_1] : memref<8x128xf32, #tpu.memory_space<vmem>>, vector<8x128xf32>
    %c0_2 = arith.constant 0 : index
    %c0_3 = arith.constant 0 : index
    %4 = vector.load %arg3[%c0_2, %c0_3] : memref<8x32xf32, #tpu.memory_space<vmem>>, vector<8x32xf32>
    %c0_4 = arith.constant 0 : index
    %c0_5 = arith.constant 0 : index
    %5 = vector.load %arg4[%c0_4, %c0_5] : memref<32x128xf32, #tpu.memory_space<vmem>>, vector<32x128xf32>
    %cst = arith.constant dense<0.000000e+00> : vector<8x128xf32>
    %6 = tpu.matmul %4, %5, %cst {dimension_numbers = #tpu.dot_dimension_numbers<[1], [0], [0], [1], [0, 0, 1, 1], [], []>} : vector<8x32xf32>, vector<32x128xf32>, vector<8x128xf32> -> vector<8x128xf32>
    %7 = arith.addf %3, %6 : vector<8x128xf32>
    %c0_6 = arith.constant 0 : index
    %c0_7 = arith.constant 0 : index
    %8 = vector.load %arg7[%c0_6, %c0_7] : memref<8x128xf32, #tpu.memory_space<vmem>>, vector<8x128xf32>
    tpu.vector_store %arg7[%c0_6, %c0_7], %7 {strides = array<i32>} : memref<8x128xf32, #tpu.memory_space<vmem>>, vector<8x128xf32>,
    %c0_i32_8 = arith.constant 0 : i32
    %9 = arith.cmpi eq, %arg2, %c0_i32_8 : i32
    %10 = arith.extui %9 : i1 to i32
    %c0_i32_9 = arith.constant 0 : i32
    %11 = arith.cmpi ne, %10, %c0_i32_9 : i32
    scf.if %11 {
      %c0_10 = arith.constant 0 : index
      %c0_11 = arith.constant 0 : index
      %12 = vector.load %arg7[%c0_10, %c0_11] : memref<8x128xf32, #tpu.memory_space<vmem>>, vector<8x128xf32>
      %c0_12 = arith.constant 0 : index
      %c0_13 = arith.constant 0 : index
      %13 = vector.load %arg5[%c0_12, %c0_13] : memref<1x128xf32, #tpu.memory_space<vmem>>, vector<1x128xf32>
      %14 = vector.broadcast %13 : vector<1x128xf32> to vector<8x128xf32>
      %15 = arith.addf %12, %14 : vector<8x128xf32>
      %c0_14 = arith.constant 0 : index
      %c0_15 = arith.constant 0 : index
      %16 = vector.load %arg6[%c0_14, %c0_15] : memref<8x128xf32, #tpu.memory_space<vmem>>, vector<8x128xf32>
      tpu.vector_store %arg6[%c0_14, %c0_15], %15 {strides = array<i32>} : memref<8x128xf32, #tpu.memory_space<vmem>>, vector<8x128xf32>,
    } else {
    }
    return
  }
  func.func @transform_0(%arg0: i32, %arg1: i32, %arg2: i32) -> (i32, i32) {
    %c0_i32 = arith.constant 0 : i32
    return %arg1, %arg2 : i32, i32
  }
  func.func @transform_1(%arg0: i32, %arg1: i32, %arg2: i32) -> (i32, i32) {
    %c0_i32 = arith.constant 0 : i32
    return %arg2, %arg0 : i32, i32
  }
  func.func @transform_2(%arg0: i32, %arg1: i32, %arg2: i32) -> (i32, i32) {
    %c0_i32 = arith.constant 0 : i32
    %c0_i32_0 = arith.constant 0 : i32
    return %c0_i32, %arg0 : i32, i32
  }
  func.func @transform_3(%arg0: i32, %arg1: i32, %arg2: i32) -> (i32, i32) {
    %c0_i32 = arith.constant 0 : i32
    return %arg1, %arg0 : i32, i32
  }
}

</mosaic_0001>

<bundles_post_ra>
// kernel: _lambda_.1
= control target key start
LH: loop header
LB: loop body
LE: loop exit
PB: predicated region body
PF: predicated region fallthrough
CT: control target
= control target key end

     0   :  { %8 = vsyncpa [#allocation4], 0  ;;  %s927_s0 = inlined_call_operand.hbm [shape: f32[8,32], index: 0, kind: input, shape index: {}]   ;;  %s928_s1 = inlined_call_operand.hbm [shape: f32[32,384], index: 1, kind: input, shape index: {}]   ;;  %s929_s2 = inlined_call_operand.hbm [shape: f32[1,384], index: 2, kind: input, shape index: {}]   ;;  %s930_s3 = inlined_call_operand.hbm [shape: f32[8,384], index: 3, kind: output, shape index: {}]  }
   0x1   :  { %9 = vsyncpa [#allocation7], 0 }
   0x2   :  { %11 = vsyncpa [#allocation7 + $0x1], 0 }
   0x3   :  { %12 = vsyncpa [#allocation5], 0 }
   0x4   :  { %14 = vsyncpa [#allocation5 + $0x1], 0  ;;  %s755_s12 = smov 0   ;;  %s757_s13 = smov 0  }
   0x5   :  { %s759_s14 = smov 0   ;;  %s761_s15 = smov 0  }
   0x6   :  { %s763_s16 = smov 0   ;;  %s765_s17 = smov 0  }
   0x7 LB: > { %s39_s18 = sadd.s32 1, %s725_s16  ;;  %s76_s19 = sadd.s32 1, %s717_s14  ;;  %s729_s17 = sphi %s765_s17, %s20_s17   ;;  %s725_s16 = sphi %s763_s16, %s941_s16   ;;  %s721_s15 = sphi %s761_s15, %s940_s15   ;;  %s717_s14 = sphi %s759_s14, %s939_s14   ;;  %s713_s13 = sphi %s757_s13, %s938_s13   ;;  %s709_s12 = sphi %s755_s12, %s937_s12  }
   0x8   : > { %p41_p0 = scmp.ge.s32.totalorder %s39_s18, 3  ;;  %p83_p1 = scmp.ne.s32.totalorder %s717_s14, %s713_s13 }
   0x9   : > { %p84_p2 = scmp.eq.s32.totalorder %s729_s17, 0  ;;  %p497_p4 = scmp.lt.s32.totalorder %s729_s17, 3 }
   0xa   : > { %s943_s18 = smov (%p41_p0, %s39_s18), 0  ;;  %s182_s22 = sand.u32 1, %s729_s17  }
   0xb   : > { %p795_p3 = por %p84_p2, %p83_p1  ;;  %s72_s21 = ssub.s32 %s725_s16, %s943_s18 }
   0xc   : > { %p74_p5 = scmp.eq.s32.totalorder %s72_s21, 0  ;;  %s184_s23 = sand.u32 1, %s717_s14  }
   0xd   : > { %s461_s24 = sshll.u32 %s725_s16, 3  ;;  %s460_s26 = sshll.u32 %s184_s23, 5 }
   0xe   : > { %s806_s25 = scalar_select %p74_p5, %s717_s14, %s76_s19  }
   0xf   : > { %s193_s29 = scalar_lea.hbm %s928_s1, %s461_s24  ;;  %s186_s4 = scalar_lea.vmem [#allocation6], %s460_s26 }
  0x10   : > { %s194_s30 = sshll.u32 %s193_s29, 4  ;;  %s196_s5 = sshll.u32 %s186_s4, 4  ;;  %s195_s30 = int_to_ptr.hbm [resolvable:$true] %s194_s30  ;;  %s197_s5 = int_to_ptr.vmem [resolvable:$true] %s196_s5 }
  0x11   : > { %p817_p6 = pnand %p497_p4, %p795_p3  ;;  %s821_s7 = scalar_lea.sflag [#allocation7], %s182_s22 }
  0x12   : > { %s731_s8 = smov 384   ;;  %s732_s9 = smov 128  }
  0x13   : > { %s733_s10 = smov 8   ;;  %s827_s11 = sadd.s32 4294967295, %s729_s17  }
  0x14   : > { %488 = dma.hbm_to_vmem [thread:$0]  (!%p817_p6), %s195_s30, 512, %s197_s5, %s821_s7, %s731_s8, %s732_s9, %s733_s10  }
  0x15   : > { %s456_s19 = sadd.s32 4294967294, %s729_s17   ;;  %p89_p7 = scmp.ne.s32.totalorder %s713_s13, %s709_s12 }
  0x16   : > { %p90_p8 = scmp.eq.s32.totalorder %s827_s11, 0  ;;  %p141_p9 = scmp.eq.s32.totalorder %s827_s11, 2 }
  0x17   : > { %p147_p10 = scmp.eq.s32.totalorder %s456_s19, 2  ;;  %p457_p12 = scmp.ge.s32.totalorder %s729_s17, 1 }
  0x18   : > { %p836_p11 = por %p90_p8, %p89_p7  ;;  %p844_p13 = por %p141_p9, %p83_p1 }
  0x19   : > { %p848_p0 = por %p147_p10, %p89_p7  ;;  %p154_p2 = scmp.lt.s32.totalorder %s729_s17, 4 }
  0x1a   : > { %s169_s27 = sshll.u32 %s927_s0, 4  ;;  %s734_s29 = smov [#allocation3]   ;;  %s170_s27 = int_to_ptr.hbm [resolvable:$true] %s169_s27 }
  0x1b   : > { %p856_p3 = pnand %p457_p12, %p154_p2  ;;  %s171_s30 = sshll.u32 %s734_s29, 4  ;;  %s172_s30 = int_to_ptr.vmem [resolvable:$true] %s171_s30 }
  0x1c   : > { %s212_s8 = scalar_lea.hbm %s929_s2, %s725_s16  ;;  %s209_s9 = scalar_lea.vmem [#allocation8], %s184_s23 }
  0x1d   : > { %p481_p1 = pneg %p856_p3  ;;  %s216_s10 = sshll.u32 %s209_s9, 4  ;;  %s217_s10 = int_to_ptr.vmem [resolvable:$true] %s216_s10 }
  0x1e   : > { %s214_s19 = sshll.u32 %s212_s8, 4  ;;  %225 = sbr.rel (%p856_p3) target bundleno = 179 (0xb3), region = 32  ;;  %s215_s19 = int_to_ptr.hbm [resolvable:$true] %s214_s19 }
  0x1f   : > { %p482_p4 = pnand %p481_p1, %p90_p8 }
  0x20   : > { %491 = dma.hbm_to_vmem [thread:$0]  (!%p817_p6), %s215_s19, 16, %s217_s10, %s821_s7  }
  0x21   : > { %484 = dma.hbm_to_vmem [thread:$0]  (!%p482_p4), %s170_s27, 128, %s172_s30, [#allocation4]  }
  0x23   : > { %696 = dma.done.wait (%p90_p8), [#allocation4], 128  }
  0x24   : > { %698 = vsyncadd (%p90_p8), [#allocation4], 4294967168  ;;  %s232_s23 = sand.u32 1, %s827_s11   ;;  %s881_s24 = sand.u32 1, %s713_s13  }
  0x25   : > { %s464_s26 = sshll.u32 %s881_s24, 5  ;;  %s233_s27 = scalar_lea.sflag [#allocation7], %s232_s23 }
  0x26   : > { %s236_s6 = scalar_lea.vmem [#allocation6], %s464_s26 }
  0x27   : > { %700 = dma.done.wait (%p836_p11), %s233_s27, 528  }
  0x28   : > { %702 = vsyncadd (%p836_p11), %s233_s27, 4294966768  ;;  %v284_v0 = vld [vmem:[%s236_s6 + $0x18] sm:$0xff]  ;;  %v283_v1 = vld [vmem:[%s236_s6 + $0x10] sm:$0xff]  ;;  %s245_s7 = scalar_lea.vmem [#allocation8], %s881_s24  ;;  %vm285_vm0 = vcmask 261120   ;;  %s465_s11 = sshll.u32 %s881_s24, 3 }
  0x29   : > { %301 = vmatpush.msra.mxu0 %v284_v0  ;;  %v282_v2 = vld [vmem:[%s236_s6 + $0x8] sm:$0xff]  ;;  %v281_v3 = vld [vmem:[%s236_s6] sm:$0xff]  ;;  %v280_v4 = vld [vmem:[#allocation3] sm:$0xff]  ;;  %s468_s28 = sshll.u32 %s721_s15, 3  ;;  %s272_s4 = scalar_lea.vmem [#allocation9], %s465_s11 }
  0x2a   : > { %s334_s30 = scalar_lea.hbm %s930_s3, %s468_s28  ;;  %v552_v5 = vld [vmem:[%s245_s7] ss:$0 sm:$0xff]  ;;  %s336_s5 = sshll.u32 %s272_s4, 4  ;;  %s337_s5 = int_to_ptr.vmem [resolvable:$true] %s336_s5 }
  0x2b   : > { %302 = vmatpush.msra.mxu0 %v283_v1  ;;  %s338_s8 = sshll.u32 %s334_s30, 4  ;;  %s322_s9 = scalar_lea.sflag [#allocation5], %s881_s24  ;;  %s339_s8 = int_to_ptr.hbm [resolvable:$true] %s338_s8 }
  0x2c   : > { %s657_s10 = sshra.s32 %s339_s8, 4  ;;  %s663_s26 = scalar_lea.hbm %s930_s3, 24  ;;  %s658_s10 = int_to_ptr.hbm [resolvable:$true] %s657_s10 }
  0x2d   : > { %303 = vmatpush.msra.mxu0 %v282_v2  ;;  %s659_s19 = scalar_lea.hbm %s658_s10, 8  ;;  %p664_p8 = scmp.lt.s32.totalorder %s658_s10, %s930_s3 }
  0x2e   : > { %p660_p5 = scmp.ne.s32.totalorder %s658_s10, %s659_s19  ;;  %p665_p9 = scmp.lt.s32.totalorder %s663_s26, %s659_s19 }
  0x2f   : > { %304 = vmatpush.msra.mxu0 %v281_v3 }
  0x30   : > { %466 = vmatmul.msk.f32.vlgmr.msra.gmra.mxu0 %vm285_vm0, %v280_v4  ;;  %p661_p6 = pnand %p660_p5, %p844_p13  ;;  %p666_p10 = por %p665_p9, %p664_p8 }
  0x32   : > { %p662_p7 = pneg %p661_p6 }
  0x34   : > { %p667_p11 = pnand %p666_p10, %p662_p7 }
  0xad   : > { %v306_v6 = vpop.f32.mrf.mxu0 }
  0xae   : > { %v319_v7 = vadd.f32 %v552_v5, %v306_v6 }
  0xb0   : > { %320 = vst [vmem:[%s272_s4] sm:$0xff] %v319_v7 }
  0xb1   : > { %670 = shalt.err (!%p667_p11)
}
  0xb2   : > { %479 = dma.vmem_to_hbm [thread:$0]  (%p844_p13), %s337_s5, 128, %s339_s8, %s322_s9  }
  0xb3 PF: > { %p499_p12 = scmp.ge.s32.totalorder %s729_s17, 2  ;;  %s350_s24 = sand.u32 1, %s709_s12  }
  0xb4   : > { %s351_s7 = scalar_lea.sflag [#allocation5], %s350_s24 }
  0xb5   : > { %p493_p2 = pnand %p499_p12, %p848_p0 }
  0xb7   : > { %p494_p3 = pneg %p493_p2 }
  0xb9   : > { %704 = dma.done.wait (%p494_p3), %s351_s7, 128  }
  0xba   : > { %706 = vsyncadd (%p494_p3), %s351_s7, 4294967168  ;;  %s20_s17 = sadd.s32 1, %s729_s17   ;;  %s937_s12 = smov %s713_s13 }
  0xbb   : > { %p17_p1 = scmp.ge.s32.totalorder %s20_s17, 5   ;;  %s938_s13 = smov %s717_s14 }
  0xbc   : > { %s939_s14 = smov %s806_s25  ;;  %s940_s15 = smov %s725_s16 }
  0xbd   : > { %s941_s16 = smov %s943_s18  ;;  %19 = sbr.rel (!%p17_p1) target bundleno = 7 (0x7), region = 102 }
  0xc2   :  { %357 = vsyncpa [#allocation4], 1 }
  0xc3   :  { %359 = vsyncpa [#allocation4 + $0x1], 1 }
  0xc4   :  { %360 = vsyncpa [#allocation7], 1 }
  0xc5   :  { %362 = vsyncpa [#allocation7 + $0x1], 1 }
  0xc6   :  { %363 = vsyncpa [#allocation5], 1 }
  0xc7   :  { %365 = vsyncpa [#allocation5 + $0x1], 1 }

</bundles_post_ra>
